<compile_context>
chip_gen: v7x
topology: tpu7x:2x2x1
jax: 0.10.0
libtpu: 0.0.40
codegen_flags: <defaults>
</compile_context>

<pallas_src>
import functools

import numpy as np
import jax
import jax.numpy as jnp
from jax import lax
from jax.experimental import pallas as pl
from jax.experimental.pallas import tpu as pltpu

SIDE = 8
NEG_SLOPE = 0.2
BN_EPS = 1e-5

# Parameter-slab row layout: one (324, 256) f32 input => one DMA for all params.
_W1_ROWS = slice(0, 64)      # (64, 256)  layer-1 expanded weight (lanes 0:256)
_W2_ROWS = slice(64, 320)    # (256, 128) layer-2 expanded weight (lanes 0:128)
_B1_ROW = 320                # (256,)     BN1 shift tiled per output position
_B2_ROW = 321                # (128,)     BN2 shift tiled per output position
_W3_ROW = 322                # (128,)     head weight, lanes (ky, kx, cin)
_B3_ROW = 323                # lane 0     head bias
_SLAB_ROWS = 324


# ---------------------------------------------------------------------------
# Fused Pallas kernel: whole `seq` forward, all intermediates stay in vregs.
# ---------------------------------------------------------------------------
def tablegan_seq_kernel(xf_ref, p_ref, out_ref):
    """xf_ref : (bn, 64)   masked input, flattened (iy, ix), C=1 squeezed
       p_ref  : (324, 256) packed parameter slab (layout above)
       out_ref: (bn, 1)    logits
    """
    x = xf_ref[...]                                        # (bn, 64)

    # layer 1: Conv(1->16,k4,s2,p1) + folded BN + LeakyReLU as ONE matmul.
    # Sliding window + zero padding are baked into W1_big's sparsity.
    w1 = p_ref[_W1_ROWS, :]                                # (64, 256)
    b1 = p_ref[_B1_ROW:_B1_ROW + 1, :]                     # (1, 256)
    h1 = jnp.dot(x, w1, preferred_element_type=jnp.float32) + b1
    h1 = jnp.maximum(h1, NEG_SLOPE * h1)                   # (bn, 256) lanes (oy,ox,c)

    # layer 2: Conv(16->32,k4,s2,p1) + folded BN + LeakyReLU as ONE matmul.
    w2 = p_ref[_W2_ROWS, 0:128]                            # (256, 128)
    b2 = p_ref[_B2_ROW:_B2_ROW + 1, 0:128]                 # (1, 128)
    h2 = jnp.dot(h1, w2, preferred_element_type=jnp.float32) + b2
    h2 = jnp.maximum(h2, NEG_SLOPE * h2)                   # (bn, 128) lanes (oy,ox,c)

    # layer 3: Conv(32->1,k2,s1,p0) + bias == per-sample dot product:
    # VPU multiply + XLU lane reduction (MXU stays free).
    w3 = p_ref[_W3_ROW:_W3_ROW + 1, 0:128]                 # (1, 128)
    b3 = p_ref[_B3_ROW:_B3_ROW + 1, 0:1]                   # (1, 1)
    # TODO(synk): for large gridded batches, store logits lane-dense (1, bn)
    # instead of (bn, 1) to avoid masked vst on every block.
    out_ref[...] = jnp.sum(h2 * w3, axis=-1, keepdims=True) + b3


# ---------------------------------------------------------------------------
# Parameter folding: BN -> conv weights, convs -> dense matmul weights, all
# packed into one slab.
# ---------------------------------------------------------------------------
def fold_params(params):
    w1 = np.asarray(params["w1"], np.float32)              # (16, 1, 4, 4) OIHW
    w2 = np.asarray(params["w2"], np.float32)              # (32, 16, 4, 4)
    w3 = np.asarray(params["w3"], np.float32)              # (1, 32, 2, 2)
    b3 = np.asarray(params["b3"], np.float32)               # (1,)
    s1 = np.asarray(params["bn1_scale"], np.float32)
    sh1 = np.asarray(params["bn1_shift"], np.float32)
    s2 = np.asarray(params["bn2_scale"], np.float32)
    sh2 = np.asarray(params["bn2_shift"], np.float32)

    w1f = w1[:, 0] * s1[:, None, None]                     # (cout=16, ky, kx)
    w2f = w2 * s2[:, None, None, None]                     # (cout=32, cin=16, ky, kx)

    # Layer 1: x_flat (n,64) @ W1_big (64,256) -> h1 (n,256), lanes (oy,ox,c).
    W1_big = np.zeros((64, 256), np.float32)
    for iy in range(SIDE):
        for ix in range(SIDE):
            row = iy * SIDE + ix
            for oy in range(4):
                ky = iy + 1 - 2 * oy
                if not 0 <= ky < 4:
                    continue
                for ox in range(4):
                    kx = ix + 1 - 2 * ox
                    if not 0 <= kx < 4:
                        continue
                    col = (oy * 4 + ox) * 16
                    W1_big[row, col:col + 16] = w1f[:, ky, kx]
    b1_big = np.tile(sh1, 16)                               # (256,)

    # Layer 2: h1 (n,256) @ W2_big (256,128) -> h2 (n,128), lanes (oy,ox,c).
    # Zero h1-padding contributes nothing, so out-of-window rows stay zero.
    W2_big = np.zeros((256, 128), np.float32)
    for iy in range(4):
        for ix in range(4):
            row = (iy * 4 + ix) * 16
            for oy in range(2):
                ky = iy + 1 - 2 * oy
                if not 0 <= ky < 4:
                    continue
                for ox in range(2):
                    kx = ix + 1 - 2 * ox
                    if not 0 <= kx < 4:
                        continue
                    col = (oy * 2 + ox) * 32
                    W2_big[row:row + 16, col:col + 32] = w2f[:, :, ky, kx].T
    b2_big = np.tile(sh2, 4)                                # (128,)

    # Head: lanes ordered (ky, kx, cin) to match h2's (oy, ox, cout).
    w3_flat = w3[0].transpose(1, 2, 0).reshape(128)

    slab = np.zeros((_SLAB_ROWS, 256), np.float32)
    slab[_W1_ROWS, :] = W1_big
    slab[_W2_ROWS, 0:128] = W2_big
    slab[_B1_ROW, :] = b1_big
    slab[_B2_ROW, 0:128] = b2_big
    slab[_W3_ROW, 0:128] = w3_flat
    slab[_B3_ROW, 0] = b3[0]
    return jnp.asarray(slab)


# ---------------------------------------------------------------------------
# Wrapper: masking + flatten + single pallas_call (gridded over batch).
# ---------------------------------------------------------------------------
@functools.partial(jax.jit, static_argnums=(3, 4))
def classifier_forward(x, pslab, masking, r, c):
    """Masked `self.seq(input)` logits + 2-scalar label (TableGAN usage)."""
    n = x.shape[0]
    # Label (2 scalars) straight from the unmasked input -- stays in the wrapper.
    label = (x[:, 0, r, c] + 1.0) * 0.5
    # Mask + flatten in the wrapper: one tiny XLA fusion; the lane-contiguous
    # (n, 64) input removes all in-kernel im2col and DMA tile padding.
    xf = (x * masking).reshape(n, SIDE * SIDE)

    # Grid over the batch so both v7x TensorCores share work when n is large;
    # block footprint (<<1 MiB) is far under v7x's 64 MiB VMEM (128 on v5e/v6e).
    block_n = min(n, 1024)
    n_pad = -(-n // block_n) * block_n
    if n_pad != n:
        xf = jnp.pad(xf, ((0, n_pad - n), (0, 0)))

    logits = pl.pallas_call(
        tablegan_seq_kernel,
        out_shape=jax.ShapeDtypeStruct((n_pad, 1), jnp.float32),
        grid=(n_pad // block_n,),
        in_specs=[
            pl.BlockSpec((block_n, SIDE * SIDE), lambda i: (i, 0)),
            pl.BlockSpec((_SLAB_ROWS, 256), lambda i: (0, 0)),  # resident params
        ],
        out_specs=pl.BlockSpec((block_n, 1), lambda i: (i, 0)),
        compiler_params=pltpu.CompilerParams(
            dimension_semantics=("parallel",)),
    )(xf, pslab)

    return logits[:n].reshape(-1), label


# ---------------------------------------------------------------------------
# Pure-JAX reference (correctness check)
# ---------------------------------------------------------------------------
def _ref_conv(x, w, stride, padding, bias=None):
    out = lax.conv_general_dilated(
        x, w, window_strides=(stride, stride),
        padding=[(padding, padding)] * 2,
        dimension_numbers=("NCHW", "OIHW", "NCHW"))
    if bias is not None:
        out = out + bias[None, :, None, None]
    return out


def ref_forward(x, params, masking, r, c):
    label = (x[:, :, r, c].reshape(-1) + 1.0) / 2.0
    xm = x * masking
    h = _ref_conv(xm, params["w1"], 2, 1)
    h = h * params["bn1_scale"][None, :, None, None] + params["bn1_shift"][None, :, None, None]
    h = jnp.where(h >= 0.0, h, NEG_SLOPE * h)
    h = _ref_conv(h, params["w2"], 2, 1)
    h = h * params["bn2_scale"][None, :, None, None] + params["bn2_shift"][None, :, None, None]
    h = jnp.where(h >= 0.0, h, NEG_SLOPE * h)
    h = _ref_conv(h, params["w3"], 1, 0, params["b3"])
    return h.reshape(-1), label


# ---------------------------------------------------------------------------
def make_params(key):
    ks = jax.random.split(key, 12)

    def bn(gamma, beta, mean, var):
        scale = gamma / jnp.sqrt(var + BN_EPS)
        return scale, beta - mean * scale

    w1 = 0.1 * jax.random.normal(ks[0], (16, 1, 4, 4), jnp.float32)
    w2 = 0.1 * jax.random.normal(ks[1], (32, 16, 4, 4), jnp.float32)
    w3 = 0.1 * jax.random.normal(ks[2], (1, 32, 2, 2), jnp.float32)
    b3 = 0.1 * jax.random.normal(ks[3], (1,), jnp.float32)

    g1 = 1.0 + 0.1 * jax.random.normal(ks[4], (16,), jnp.float32)
    be1 = 0.1 * jax.random.normal(ks[5], (16,), jnp.float32)
    m1 = 0.1 * jax.random.normal(ks[6], (16,), jnp.float32)
    v1 = 0.5 + jnp.abs(jax.random.normal(ks[7], (16,), jnp.float32))
    s1, sh1 = bn(g1, be1, m1, v1)

    g2 = 1.0 + 0.1 * jax.random.normal(ks[8], (32,), jnp.float32)
    be2 = 0.1 * jax.random.normal(ks[9], (32,), jnp.float32)
    m2 = 0.1 * jax.random.normal(ks[10], (32,), jnp.float32)
    v2 = 0.5 + jnp.abs(jax.random.normal(ks[11], (32,), jnp.float32))
    s2, sh2 = bn(g2, be2, m2, v2)

    return {"w1": w1, "bn1_scale": s1, "bn1_shift": sh1,
            "w2": w2, "bn2_scale": s2, "bn2_shift": sh2,
            "w3": w3, "b3": b3}


if __name__ == "__main__":
    key = jax.random.PRNGKey(0)
    k_in, k_par = jax.random.split(key)

    # fake tabular data embedded into side x side images, values in [-1, 1]
    batch = 2
    x = jax.random.uniform(k_in, (batch, 1, SIDE, SIDE), jnp.float32, -1.0, 1.0)

    # meta: last column is the binary label at flat index len(meta)-1
    index = 60 - 1                       # len(meta) - 1
    r, c = index // SIDE, index % SIDE
    masking = jnp.ones((1, 1, SIDE, SIDE), jnp.float32).at[0, 0, r, c].set(0.0)

    params = make_params(k_par)
    pslab = fold_params(params)

    logits, label = classifier_forward(x, pslab, masking, r, c)
    jax.block_until_ready((logits, label))

    ref_logits, ref_label = ref_forward(x, params, masking, r, c)
    assert logits.shape == (batch,) and label.shape == (batch,)
    assert jnp.allclose(logits, ref_logits, atol=2e-4, rtol=2e-4)
    assert jnp.allclose(label, ref_label, atol=1e-6)

    print("KERNEL_OK")
</pallas_src>

<mosaic_0001>
module attributes {stable_mosaic.version = 11 : i64} {
  func.func @tablegan_seq_kernel(%arg0: i32, %arg1: memref<2x64xf32, #tpu.memory_space<vmem>>, %arg2: memref<324x256xf32, #tpu.memory_space<vmem>>, %arg3: memref<2x1xf32, #tpu.memory_space<vmem>>) attributes {dimension_semantics = [#tpu.dimension_semantics<parallel>], iteration_bounds = array<i64: 1>, scalar_prefetch = 0 : i64, scratch_operands = 0 : i64, tpu.core_type = #tpu.core_type<tc>, window_params = [{transform_indices = @transform_0, window_bounds = array<i64: 2, 64>}, {pipeline_mode = #tpu.pipeline_mode<synchronous>, transform_indices = @transform_1, window_bounds = array<i64: 324, 256>}, {transform_indices = @transform_2, window_bounds = array<i64: 2, 1>}]} {
    %c0 = arith.constant 0 : index
    %c0_0 = arith.constant 0 : index
    %0 = vector.load %arg1[%c0, %c0_0] : memref<2x64xf32, #tpu.memory_space<vmem>>, vector<2x64xf32>
    %c0_1 = arith.constant 0 : index
    %c0_2 = arith.constant 0 : index
    %1 = vector.load %arg2[%c0_1, %c0_2] : memref<324x256xf32, #tpu.memory_space<vmem>>, vector<64x256xf32>
    %c320 = arith.constant 320 : index
    %c0_3 = arith.constant 0 : index
    %2 = vector.load %arg2[%c320, %c0_3] : memref<324x256xf32, #tpu.memory_space<vmem>>, vector<1x256xf32>
    %cst = arith.constant dense<0.000000e+00> : vector<2x256xf32>
    %3 = tpu.matmul %0, %1, %cst {dimension_numbers = #tpu.dot_dimension_numbers<[1], [0], [0], [1], [0, 0, 1, 1], [], []>} : vector<2x64xf32>, vector<64x256xf32>, vector<2x256xf32> -> vector<2x256xf32>
    %4 = vector.broadcast %2 : vector<1x256xf32> to vector<2x256xf32>
    %5 = arith.addf %3, %4 : vector<2x256xf32>
    %cst_4 = arith.constant 2.000000e-01 : f32
    %6 = vector.broadcast %cst_4 : f32 to vector<2x256xf32>
    %7 = arith.mulf %6, %5 : vector<2x256xf32>
    %8 = arith.maximumf %5, %7 : vector<2x256xf32>
    %c64 = arith.constant 64 : index
    %c0_5 = arith.constant 0 : index
    %9 = vector.load %arg2[%c64, %c0_5] : memref<324x256xf32, #tpu.memory_space<vmem>>, vector<256x128xf32>
    %c321 = arith.constant 321 : index
    %c0_6 = arith.constant 0 : index
    %10 = vector.load %arg2[%c321, %c0_6] : memref<324x256xf32, #tpu.memory_space<vmem>>, vector<1x128xf32>
    %cst_7 = arith.constant dense<0.000000e+00> : vector<2x128xf32>
    %11 = tpu.matmul %8, %9, %cst_7 {dimension_numbers = #tpu.dot_dimension_numbers<[1], [0], [0], [1], [0, 0, 1, 1], [], []>} : vector<2x256xf32>, vector<256x128xf32>, vector<2x128xf32> -> vector<2x128xf32>
    %12 = vector.broadcast %10 : vector<1x128xf32> to vector<2x128xf32>
    %13 = arith.addf %11, %12 : vector<2x128xf32>
    %cst_8 = arith.constant 2.000000e-01 : f32
    %14 = vector.broadcast %cst_8 : f32 to vector<2x128xf32>
    %15 = arith.mulf %14, %13 : vector<2x128xf32>
    %16 = arith.maximumf %13, %15 : vector<2x128xf32>
    %c322 = arith.constant 322 : index
    %c0_9 = arith.constant 0 : index
    %17 = vector.load %arg2[%c322, %c0_9] : memref<324x256xf32, #tpu.memory_space<vmem>>, vector<1x128xf32>
    %c323 = arith.constant 323 : index
    %c0_10 = arith.constant 0 : index
    %18 = vector.load %arg2[%c323, %c0_10] : memref<324x256xf32, #tpu.memory_space<vmem>>, vector<1x1xf32>
    %19 = vector.broadcast %17 : vector<1x128xf32> to vector<2x128xf32>
    %20 = arith.mulf %16, %19 : vector<2x128xf32>
    %cst_11 = arith.constant dense<0.000000e+00> : vector<2xf32>
    %21 = vector.multi_reduction <add>, %20, %cst_11 [1] : vector<2x128xf32> to vector<2xf32>
    %22 = vector.shape_cast %21 : vector<2xf32> to vector<2x1xf32>
    %23 = vector.broadcast %18 : vector<1x1xf32> to vector<2x1xf32>
    %24 = arith.addf %22, %23 : vector<2x1xf32>
    %c0_12 = arith.constant 0 : index
    %c0_13 = arith.constant 0 : index
    %25 = vector.load %arg3[%c0_12, %c0_13] : memref<2x1xf32, #tpu.memory_space<vmem>>, vector<2x1xf32>
    tpu.vector_store %arg3[%c0_12, %c0_13], %24 {strides = array<i32>} : memref<2x1xf32, #tpu.memory_space<vmem>>, vector<2x1xf32>,
    return
  }
  func.func @transform_0(%arg0: i32) -> (i32, i32) {
    %c0_i32 = arith.constant 0 : i32
    %c0_i32_0 = arith.constant 0 : i32
    return %arg0, %c0_i32 : i32, i32
  }
  func.func @transform_1(%arg0: i32) -> (i32, i32) {
    %c0_i32 = arith.constant 0 : i32
    %c0_i32_0 = arith.constant 0 : i32
    %c0_i32_1 = arith.constant 0 : i32
    return %c0_i32, %c0_i32_0 : i32, i32
  }
  func.func @transform_2(%arg0: i32) -> (i32, i32) {
    %c0_i32 = arith.constant 0 : i32
    %c0_i32_0 = arith.constant 0 : i32
    return %arg0, %c0_i32 : i32, i32
  }
}

</mosaic_0001>

<bundles_post_ra>
// kernel: classifier_forward.1
= control target key start
LH: loop header
LB: loop body
LE: loop exit
PB: predicated region body
PF: predicated region fallthrough
CT: control target
= control target key end

     0   :  { %7 = vsyncpa [#allocation3], 0  ;;  %s366_s9 = smov [#allocation2]   ;;  %s403_s0 = inlined_call_operand.vmem [shape: f32[2,64], index: 0, kind: input, shape index: {}]   ;;  %s404_s1 = inlined_call_operand.hbm [shape: f32[324,256], index: 1, kind: input, shape index: {}]   ;;  %s405_s2 = inlined_call_operand.vmem [shape: f32[2,1], index: 2, kind: output, shape index: {}]  }
   0x1   :  { %s15_s10 = sshll.u32 %s366_s9, 4  ;;  %s342_s13 = scalar_lea.hbm %s404_s1, 10496  ;;  %s16_s10 = int_to_ptr.vmem [resolvable:$true] %s15_s10 }
   0x2   :  { %p343_p0 = scmp.ne.s32.totalorder %s404_s1, %s342_s13  ;;  %p346_p1 = scmp.lt.u32.totalorder %s342_s13, %s404_s1 }
   0x4   :  { %p348_p2 = pnand %p346_p1, %p343_p0 }
   0x6   :  { %351 = shalt.err (!%p348_p2)
}
   0x7   :  { %s352_s18 = scalar_lea.vmem %s16_s10, 10496  ;;  %p357_p4 = scmp.lt.s32.totalorder %s16_s10, %s16_s10 }
   0x8   :  { %p353_p3 = scmp.ne.s32.totalorder %s16_s10, %s352_s18  ;;  %p358_p5 = scmp.lt.s32.totalorder %s352_s18, %s352_s18 }
   0xa   :  { %p359_p6 = por %p358_p5, %p357_p4 }
   0xc   :  { %p360_p7 = pnand %p359_p6, %p353_p3 }
   0xe   :  { %363 = shalt.err (!%p360_p7)
}
   0xf   :  { %s367_s19 = smov 256   ;;  %s368_s20 = smov 16  }
  0x10   :  { %21 = dma.hbm_to_vmem [thread:$0]  %s404_s1, 10496, %s16_s10, [#allocation3], %s367_s19, %s367_s19, %s368_s20  }
  0x11   :  { %364 = dma.done.wait [#allocation3], 10496  }
  0x12   :  { %365 = vsyncadd [#allocation3], 4294956800  ;;  %v369_v0 = vmov 0.0   ;;  %v27_v1 = vld [vmem:[#allocation2 + $0x8] sm:$0xff]  ;;  %v29_v2 = vld [vmem:[#allocation2 + $0x18] sm:$0xff]  ;;  %vm55_vm0 = vcmask 523264  }
  0x13   :  { %123 = vmatprep.mubr.f32.mxu0 %v369_v0  ;;  %v26_v3 = vld [vmem:[#allocation2] sm:$0xff]  ;;  %v290_v4 = vpack.c.bf16 %v29_v2, %v27_v1  ;;  %v28_v5 = vld [vmem:[#allocation2 + $0x10] sm:$0xff]  ;;  %v31_v6 = vld [vmem:[#allocation2 + $0x28] sm:$0xff]  ;;  %vm242_vm1 = vcmask 1041408   ;;  %vm247_vm2 = vcmask 1024  }
  0x14   :  { %v33_v7 = vld [vmem:[#allocation2 + $0x38] sm:$0xff]  ;;  %v292_v8 = vpack.c.bf16 %v28_v5, %v26_v3  ;;  %v30_v10 = vld [vmem:[#allocation2 + $0x20] sm:$0xff]  ;;  %v32_v11 = vld [vmem:[#allocation2 + $0x30] sm:$0xff] }
  0x15   :  { %v294_v9 = vpack.c.bf16 %v33_v7, %v31_v6  ;;  %v35_v12 = vld [vmem:[#allocation2 + $0x48] sm:$0xff]  ;;  %291 = vmatprep.subr.bf16.mxu0 %v290_v4  ;;  %v37_v13 = vld [vmem:[#allocation2 + $0x58] sm:$0xff]  ;;  %v296_v14 = vpack.c.bf16 %v32_v11, %v30_v10  ;;  %v34_v15 = vld [vmem:[#allocation2 + $0x40] sm:$0xff]  ;;  %v45_v10 = vlaneseq }
  0x16   :  { %293 = vmatpush1.bf16.msra.mxu0 %v292_v8  ;;  %v36_v16 = vld [vmem:[#allocation2 + $0x50] sm:$0xff]  ;;  %v298_v17 = vpack.c.bf16 %v37_v13, %v35_v12  ;;  %v39_v18 = vld [vmem:[#allocation2 + $0x68] sm:$0xff]  ;;  %v41_v19 = vld [vmem:[#allocation2 + $0x78] sm:$0xff] }
  0x17   :  { %295 = vmatprep.subr.bf16.mxu0 %v294_v9  ;;  %v150_v20 = vld [vmem:[#allocation2 + $0x180] sm:$0xff]  ;;  %v151_v21 = vld [vmem:[#allocation2 + $0x190] sm:$0xff]  ;;  %v300_v29 = vpack.c.bf16 %v36_v16, %v34_v15  ;;  %v302_v34 = vpack.c.bf16 %v41_v19, %v39_v18  ;;  %v46_v11 = vshrl.u32 %v45_v10, 7 }
  0x18   :  { %v134_v22 = vld [vmem:[#allocation2 + $0x80] sm:$0xff]  ;;  %v135_v23 = vld [vmem:[#allocation2 + $0x90] sm:$0xff]  ;;  %v306_v24 = vpack.c.bf16 %v151_v21, %v150_v20 }
  0x19   :  { %v308_v25 = vpack.c.bf16 %v135_v23, %v134_v22  ;;  %v152_v26 = vld [vmem:[#allocation2 + $0x1a0] sm:$0xff]  ;;  %v153_v27 = vld [vmem:[#allocation2 + $0x1b0] sm:$0xff]  ;;  %v47_v12 = vsub.s32 0, %v46_v11 }
  0x1a   :  { %v136_v28 = vld [vmem:[#allocation2 + $0xa0] sm:$0xff]  ;;  %297 = vmatpush1.bf16.msra.mxu0 %v296_v14  ;;  %v310_v30 = vpack.c.bf16 %v153_v27, %v152_v26  ;;  %v137_v31 = vld [vmem:[#allocation2 + $0xb0] sm:$0xff]  ;;  %307 = vmatprep.subr.bf16.mxu1 %v306_v24  ;;  %v51_v14 = vsub.s32 1, %v46_v11 }
  0x1b   :  { %v154_v32 = vld [vmem:[#allocation2 + $0x1c0] sm:$0xff]  ;;  %v155_v33 = vld [vmem:[#allocation2 + $0x1d0] sm:$0xff]  ;;  %299 = vmatprep.subr.bf16.mxu0 %v298_v17  ;;  %309 = vmatpush3.bf16.msra.mxu1 %v308_v25  ;;  %v312_v37 = vpack.c.bf16 %v137_v31, %v136_v28 }
  0x1c   :  { %v38_v35 = vld [vmem:[#allocation2 + $0x60] sm:$0xff]  ;;  %v40_v36 = vld [vmem:[#allocation2 + $0x70] sm:$0xff]  ;;  %311 = vmatprep.subr.bf16.mxu1 %v310_v30  ;;  %v314_v38 = vpack.c.bf16 %v155_v33, %v154_v32 }
  0x1d   :  { %v138_v39 = vld [vmem:[#allocation2 + $0xc0] sm:$0xff]  ;;  %v139_v40 = vld [vmem:[#allocation2 + $0xd0] sm:$0xff]  ;;  %v304_v41 = vpack.c.bf16 %v40_v36, %v38_v35 }
  0x1e   :  { %301 = vmatpush1.bf16.msra.mxu0 %v300_v29  ;;  %v156_v42 = vld [vmem:[#allocation2 + $0x1e0] sm:$0xff]  ;;  %v157_v43 = vld [vmem:[#allocation2 + $0x1f0] sm:$0xff]  ;;  %v316_v44 = vpack.c.bf16 %v139_v40, %v138_v39 }
  0x1f   :  { %303 = vmatprep.subr.bf16.mxu0 %v302_v34  ;;  %313 = vmatpush3.bf16.msra.mxu1 %v312_v37  ;;  %v318_v45 = vpack.c.bf16 %v157_v43, %v156_v42  ;;  %v140_v46 = vld [vmem:[#allocation2 + $0xe0] sm:$0xff]  ;;  %v141_v47 = vld [vmem:[#allocation2 + $0xf0] sm:$0xff] }
  0x20   :  { %315 = vmatprep.subr.bf16.mxu1 %v314_v38  ;;  %v25_v48 = vld [vmem:[%s403_s0] sm:$0x3]  ;;  %v159_v50 = vld [vmem:[#allocation2 + $0x210] sm:$0xff]  ;;  %v320_v51 = vpack.c.bf16 %v141_v47, %v140_v46  ;;  %v239_v31 = vld [vmem:[#allocation2 + $0x282] ss:$0 sm:$0xff] }
  0x21   :  { %v158_v49 = vld [vmem:[#allocation2 + $0x200] sm:$0xff]  ;;  %v143_v54 = vld [vmem:[#allocation2 + $0x110] sm:$0xff] }
  0x22   :  { %305 = vmatpush1.bf16.msra.mxu0 %v304_v41  ;;  %v322_v52 = vpack.c.bf16 %v159_v50, %v158_v49  ;;  %v142_v53 = vld [vmem:[#allocation2 + $0x100] sm:$0xff]  ;;  %v161_v56 = vld [vmem:[#allocation2 + $0x230] sm:$0xff] }
  0x23   :  { %317 = vmatpush3.bf16.msra.mxu1 %v316_v44  ;;  %v160_v55 = vld [vmem:[#allocation2 + $0x220] sm:$0xff]  ;;  %v324_v57 = vpack.c.bf16 %v143_v54, %v142_v53  ;;  %v145_v60 = vld [vmem:[#allocation2 + $0x130] sm:$0xff] }
  0x24   :  { %319 = vmatprep.subr.bf16.mxu1 %v318_v45  ;;  %v326_v58 = vpack.c.bf16 %v161_v56, %v160_v55  ;;  %v144_v59 = vld [vmem:[#allocation2 + $0x120] sm:$0xff]  ;;  %v163_v63 = vld [vmem:[#allocation2 + $0x250] sm:$0xff] }
  0x25   :  { %254 = vmatmul.mubr.msk.f32.vlgmr.msra.gmra.mrb[0].mxu0 %vm55_vm0, %v25_v48  ;;  %v328_v61 = vpack.c.bf16 %v145_v60, %v144_v59  ;;  %v162_v62 = vld [vmem:[#allocation2 + $0x240] sm:$0xff]  ;;  %v147_v2 = vld [vmem:[#allocation2 + $0x150] sm:$0xff] }
  0x26   :  { %v330_v0 = vpack.c.bf16 %v163_v63, %v162_v62  ;;  %v146_v1 = vld [vmem:[#allocation2 + $0x140] sm:$0xff]  ;;  %v165_v5 = vld [vmem:[#allocation2 + $0x270] sm:$0xff] }
  0x27   :  { %321 = vmatpush3.bf16.msra.mxu1 %v320_v51  ;;  %v332_v3 = vpack.c.bf16 %v147_v2, %v146_v1  ;;  %v164_v4 = vld [vmem:[#allocation2 + $0x260] sm:$0xff]  ;;  %v149_v8 = vld [vmem:[#allocation2 + $0x170] sm:$0xff] }
  0x28   :  { %323 = vmatprep.subr.bf16.mxu1 %v322_v52  ;;  %v334_v6 = vpack.c.bf16 %v165_v5, %v164_v4  ;;  %v148_v7 = vld [vmem:[#allocation2 + $0x160] sm:$0xff] }
  0x29   :  { %v336_v9 = vpack.c.bf16 %v149_v8, %v148_v7  ;;  %v43_v13 = vld [vmem:[#allocation2 + $0x280] ss:$8 sm:$0x3]  ;;  %v166_v26 = vld [vmem:[#allocation2 + $0x281] ss:$0 sm:$0xff] }
  0x2a   :  { %v48_v15 = vrot.slane %v43_v13, %v47_v12  ;;  %v52_v16 = vrot.slane %v43_v13, %v51_v14  ;;  %v240_v35 = vld [vmem:[#allocation2 + $0x283] ss:$0 sm:$0xff] }
  0x2b   :  { %325 = vmatpush3.bf16.msra.mxu1 %v324_v57 }
  0x2c   :  { %327 = vmatprep.subr.bf16.mxu1 %v326_v58 }
  0x2f   :  { %329 = vmatpush3.bf16.msra.mxu1 %v328_v61 }
  0x30   :  { %331 = vmatprep.subr.bf16.mxu1 %v330_v0 }
  0x33   :  { %333 = vmatpush3.bf16.msra.mxu1 %v332_v3 }
  0x34   :  { %335 = vmatprep.subr.bf16.mxu1 %v334_v6 }
  0x37   :  { %337 = vmatpush3.bf16.msra.mxu1 %v336_v9 }
  0xf8   :  { %v125_v17 = vpop.f32.mrb[0].mxu0 }
  0xf9   :  { %v126_v18 = vadd.f32 %v125_v17, %v48_v15  ;;  %v127_v19 = vpop.f32.mrb[1].mxu0 }
  0xfa   :  { %v128_v20 = vadd.f32 %v127_v19, %v52_v16 }
  0xfb   :  { %v130_v21 = vmul.f32 0.2, %v126_v18 }
  0xfc   :  { %v131_v22 = vmul.f32 0.2, %v128_v20 }
  0xfd   :  { %v132_v24 = vmax.f32 %v126_v18, %v130_v21 }
  0xfe   :  { %v133_v23 = vmax.f32 %v128_v20, %v131_v22 }
 0x100   :  { %231 = vmatprep.mubr.f32.mxu1 %v133_v23 }
 0x101   :  { %232 = vmatmul.mubr.f32.vlgmr.msra.gmra.mrb[0].mxu1 %v132_v24 }
 0x1d4   :  { %v287_v25 = vpop.f32.mrb[0].mxu1 }
 0x1d5   :  { %v288_v27 = vpop.f32.mrb[1].mxu1 }
 0x1d6   :  { %v289_v28 = vadd.f32 %v288_v27, %v287_v25 }
 0x1d8   :  { %v234_v29 = vadd.f32 %v289_v28, %v166_v26 }
 0x1da   :  { %v237_v30 = vmul.f32 0.2, %v234_v29 }
 0x1dc   :  { %v238_v32 = vmax.f32 %v234_v29, %v237_v30 }
 0x1de   :  { %v241_v33 = vmul.f32 %v239_v31, %v238_v32 }
 0x1e0   :  { %v243_v34 = vsel %vm242_vm1, %v241_v33, 0.0 }
 0x1e1   :  { %244 = vadd.xlane.f32.xlu0 %v243_v34 }
 0x26e   :  { %v245_v36 = vpop.xlane.xlu0 %244 }
 0x26f   :  { %v246_v37 = vadd.f32 %v245_v36, %v240_v35 }
 0x271   :  { %248 = vst.msk [vmem:[%s405_s2] sm:$0x3] %vm247_vm2, %v246_v37 }
 0x272   :  { %253 = vsyncpa [#allocation3], 1 }

</bundles_post_ra>
